<compile_context>
chip_gen: v6e
topology: v6e:2x2x1
jax: 0.10.0
libtpu: 0.0.40
codegen_flags: <defaults>
</compile_context>

<pallas_src>
import functools

import jax
import jax.numpy as jnp
from jax.experimental import pallas as pl
from jax.experimental.pallas import tpu as pltpu


def simmim_kernel(z_ref, x_ref, w_ref, b_ref, spe_ref, spa_ref, num_ref, *, mask_style):
    """One (batch b, L-tile l) block: decoder matmul + L1 + masked partial sum.

    z_ref   : (1, E, Lt)  encoder output tile (bf16)
    x_ref   : (1, C, Lt)  reconstruction-target tile (f32)
    w_ref   : (C, E)      decoder Conv1d(k=1) weight (bf16)
    b_ref   : (C, 1)      decoder bias (f32)
    spe_ref : (1, C, 1)   spectral mask for this batch (f32)
    spa_ref : (1, 1, Lt)  spatial mask tile for this batch (f32)
    num_ref : (1, 128)    lane-dense output block; partial numerator broadcast across lanes
    """
    z = z_ref[0]                      # (E, Lt)  bf16
    w = w_ref[...]                    # (C, E)   bf16
    bias = b_ref[...]                 # (C, 1)   f32

    # decoder: Conv1d(embed_dim, patch_dim, kernel_size=1) == W @ z + bias  (f32 accumulation)
    x_rec = jnp.dot(w, z, preferred_element_type=jnp.float32) + bias        # (C, Lt) f32

    # F.l1_loss(x, x_rec, reduction='none')
    loss_recon = jnp.abs(x_ref[0] - x_rec)                                   # (C, Lt) f32

    # mask built directly from the broadcastable terms (no zeros_like / chained adds)
    if mask_style == "both":
        mask = spe_ref[0] + spa_ref[0]        # (C,1) + (1,Lt) -> (C,Lt)
    elif mask_style == "spe":
        mask = spe_ref[0]                     # (C,1), broadcasts over lanes
    else:  # "spa"
        mask = spa_ref[0]                     # (1,Lt), broadcasts over sublanes

    num = jnp.sum(loss_recon * mask)          # scalar partial numerator (f32)

    # Lane-dense (unmasked) store: broadcast the scalar across the 128-lane output block.
    # The wrapper reads lane 0 of each block.
    num_ref[...] = jnp.full((1, 128), num, dtype=jnp.float32)


def simmim_loss(x, z, dec_w, dec_b, spectral_mask, spatial_mask, mask_style="both",
                l_tile=512, compute_dtype=jnp.bfloat16):
    """Mirrors SimMIM.forward given the encoder output z.

    Pass compute_dtype=jnp.float32 to match the PyTorch module bit-for-bit; bf16
    (default) halves HBM traffic for z / dec_w while keeping f32 accumulation.
    """
    B, C, L = x.shape
    E = z.shape[1]
    assert z.shape == (B, E, L)
    assert mask_style in ("spe", "spa", "both")

    l_tile = min(l_tile, L)
    if L % l_tile != 0:
        # TODO(synk): handle ragged L with masking / pl.BoundedSlice; fall back to one tile.
        l_tile = L
    nL = L // l_tile

    spe_f = spectral_mask.astype(jnp.float32)      # (B, C)
    spa_f = spatial_mask.astype(jnp.float32)       # (B, L)
    spe3 = spe_f[:, :, None]                       # (B, C, 1)  -> per-batch (C,1) blocks
    spa3 = spa_f[:, None, :]                       # (B, 1, L)  -> per-batch (1,Lt) blocks

    z_in = z.astype(compute_dtype)                 # bf16: halves DMA bytes of the dominant input
    w_in = dec_w.astype(compute_dtype)
    b_in = dec_b.astype(jnp.float32).reshape(C, 1)

    kernel = functools.partial(simmim_kernel, mask_style=mask_style)

    # Per-block partial numerators, one lane-dense (1,128) slot per (b, l) grid cell.
    out = pl.pallas_call(
        kernel,
        out_shape=jax.ShapeDtypeStruct((1, B * nL * 128), jnp.float32),
        grid=(B, nL),
        in_specs=[
            pl.BlockSpec((1, E, l_tile), lambda b, l: (b, 0, l)),   # z tile
            pl.BlockSpec((1, C, l_tile), lambda b, l: (b, 0, l)),   # x tile
            pl.BlockSpec((C, E), lambda b, l: (0, 0)),              # decoder weight (resident)
            pl.BlockSpec((C, 1), lambda b, l: (0, 0)),              # decoder bias  (resident)
            pl.BlockSpec((1, C, 1), lambda b, l: (b, 0, 0)),        # spectral mask column
            pl.BlockSpec((1, 1, l_tile), lambda b, l: (b, 0, l)),   # spatial mask tile
        ],
        out_specs=pl.BlockSpec((1, 128), lambda b, l: (0, b * nL + l)),
        compiler_params=pltpu.CompilerParams(
            # Every grid cell writes a distinct output block -> both axes are parallel,
            # letting v7x's two TensorCores split the grid. Tiles are tiny, so the
            # default scoped-VMEM limit is plenty even on v7x (64 MiB physical).
            dimension_semantics=("parallel", "parallel"),
        ),
    )(z_in, x, w_in, b_in, spe3, spa3)

    num = jnp.sum(out.reshape(B * nL, 128)[:, 0])

    # Analytic mask denominator (exactly equals sum(mask) of the broadcast-add mask),
    # computed on the tiny 2-D mask arrays instead of a full (B, C, L) reduction.
    den = jnp.float32(0.0)
    if mask_style in ("spe", "both"):
        den = den + jnp.float32(L) * jnp.sum(spe_f)
    if mask_style in ("spa", "both"):
        den = den + jnp.float32(C) * jnp.sum(spa_f)

    return num / (den + 1e-5)


def synthetic_encoder(x, enc_w, enc_b, spectral_mask, spatial_mask):
    # TODO(synk): the real encoder is an arbitrary external module passed to SimMIM.__init__;
    # a deterministic per-position linear projection (Conv1d k=1, masks unused) stands in here.
    return jnp.einsum("ec,bcl->bel", enc_w, x) + enc_b[None, :, None]


if __name__ == "__main__":
    B, C, E, L = 2, 8, 32, 128   # batch, patch_dim, embed_dim, sequence length

    key = jax.random.PRNGKey(0)
    k1, k2, k3, k4, k5, k6, k7 = jax.random.split(key, 7)

    x = jax.random.normal(k1, (B, C, L), dtype=jnp.float32)
    spectral_mask = jax.random.bernoulli(k2, 0.5, (B, C)).astype(jnp.int32)
    spatial_mask = jax.random.bernoulli(k3, 0.5, (B, L)).astype(jnp.int32)

    # deterministic synthetic parameters (shapes implied by the module's __init__)
    enc_w = 0.1 * jax.random.normal(k4, (E, C), dtype=jnp.float32)
    enc_b = 0.1 * jax.random.normal(k5, (E,), dtype=jnp.float32)
    dec_w = 0.1 * jax.random.normal(k6, (C, E), dtype=jnp.float32)   # Conv1d(E, C, k=1) weight
    dec_b = 0.1 * jax.random.normal(k7, (C,), dtype=jnp.float32)     # Conv1d bias

    z = synthetic_encoder(x, enc_w, enc_b, spectral_mask, spatial_mask)

    loss = simmim_loss(x, z, dec_w, dec_b, spectral_mask, spatial_mask, mask_style="both")
    loss = jax.block_until_ready(loss)

    # pure-JAX reference of the same forward, using the same bf16 cast of z / dec_w
    # that the kernel uses (f32 accumulation), as the correctness gate.
    z_ref = z.astype(jnp.bfloat16).astype(jnp.float32)
    w_ref = dec_w.astype(jnp.bfloat16).astype(jnp.float32)
    x_rec_ref = (jnp.einsum("ce,bel->bcl", w_ref, z_ref,
                            precision=jax.lax.Precision.HIGHEST)
                 + dec_b[None, :, None])
    lr_ref = jnp.abs(x - x_rec_ref)
    mask_ref = (spectral_mask.astype(jnp.float32)[:, :, None]
                + spatial_mask.astype(jnp.float32)[:, None, :])
    loss_ref = (lr_ref * mask_ref).sum() / (mask_ref.sum() + 1e-5)

    assert jnp.allclose(loss, loss_ref, rtol=2e-5, atol=2e-5), (loss, loss_ref)
    print("KERNEL_OK")
</pallas_src>

<mosaic_0001>
module attributes {stable_mosaic.version = 11 : i64} {
  func.func @simmim_kernel(%arg0: i32, %arg1: i32, %arg2: memref<1x32x128xbf16, #tpu.memory_space<vmem>>, %arg3: memref<1x8x128xf32, #tpu.memory_space<vmem>>, %arg4: memref<8x32xbf16, #tpu.memory_space<vmem>>, %arg5: memref<8x1xf32, #tpu.memory_space<vmem>>, %arg6: memref<1x8x1xf32, #tpu.memory_space<vmem>>, %arg7: memref<1x1x128xf32, #tpu.memory_space<vmem>>, %arg8: memref<1x128xf32, #tpu.memory_space<vmem>>) attributes {dimension_semantics = [#tpu.dimension_semantics<parallel>, #tpu.dimension_semantics<parallel>], iteration_bounds = array<i64: 2, 1>, scalar_prefetch = 0 : i64, scratch_operands = 0 : i64, tpu.core_type = #tpu.core_type<tc>, window_params = [{transform_indices = @transform_0, window_bounds = array<i64: 1, 32, 128>}, {transform_indices = @transform_1, window_bounds = array<i64: 1, 8, 128>}, {pipeline_mode = #tpu.pipeline_mode<synchronous>, transform_indices = @transform_2, window_bounds = array<i64: 8, 32>}, {pipeline_mode = #tpu.pipeline_mode<synchronous>, transform_indices = @transform_3, window_bounds = array<i64: 8, 1>}, {transform_indices = @transform_4, window_bounds = array<i64: 1, 8, 1>}, {transform_indices = @transform_5, window_bounds = array<i64: 1, 1, 128>}, {transform_indices = @transform_6, window_bounds = array<i64: 1, 128>}]} {
    %c0 = arith.constant 0 : index
    %c0_0 = arith.constant 0 : index
    %c0_1 = arith.constant 0 : index
    %0 = vector.load %arg2[%c0, %c0_0, %c0_1] : memref<1x32x128xbf16, #tpu.memory_space<vmem>>, vector<1x32x128xbf16>
    %1 = vector.shape_cast %0 : vector<1x32x128xbf16> to vector<32x128xbf16>
    %c0_2 = arith.constant 0 : index
    %c0_3 = arith.constant 0 : index
    %2 = vector.load %arg4[%c0_2, %c0_3] : memref<8x32xbf16, #tpu.memory_space<vmem>>, vector<8x32xbf16>
    %c0_4 = arith.constant 0 : index
    %c0_5 = arith.constant 0 : index
    %3 = vector.load %arg5[%c0_4, %c0_5] : memref<8x1xf32, #tpu.memory_space<vmem>>, vector<8x1xf32>
    %cst = arith.constant dense<0.000000e+00> : vector<8x128xf32>
    %4 = tpu.matmul %2, %1, %cst {dimension_numbers = #tpu.dot_dimension_numbers<[1], [0], [0], [1], [0, 0, 1, 1], [], []>} : vector<8x32xbf16>, vector<32x128xbf16>, vector<8x128xf32> -> vector<8x128xf32>
    %5 = vector.broadcast %3 : vector<8x1xf32> to vector<8x128xf32>
    %6 = arith.addf %4, %5 : vector<8x128xf32>
    %c0_6 = arith.constant 0 : index
    %c0_7 = arith.constant 0 : index
    %c0_8 = arith.constant 0 : index
    %7 = vector.load %arg3[%c0_6, %c0_7, %c0_8] : memref<1x8x128xf32, #tpu.memory_space<vmem>>, vector<1x8x128xf32>
    %8 = vector.shape_cast %7 : vector<1x8x128xf32> to vector<8x128xf32>
    %9 = arith.subf %8, %6 : vector<8x128xf32>
    %10 = math.absf %9 : vector<8x128xf32>
    %c0_9 = arith.constant 0 : index
    %c0_10 = arith.constant 0 : index
    %c0_11 = arith.constant 0 : index
    %11 = vector.load %arg6[%c0_9, %c0_10, %c0_11] : memref<1x8x1xf32, #tpu.memory_space<vmem>>, vector<1x8x1xf32>
    %12 = vector.shape_cast %11 : vector<1x8x1xf32> to vector<8x1xf32>
    %c0_12 = arith.constant 0 : index
    %c0_13 = arith.constant 0 : index
    %c0_14 = arith.constant 0 : index
    %13 = vector.load %arg7[%c0_12, %c0_13, %c0_14] : memref<1x1x128xf32, #tpu.memory_space<vmem>>, vector<1x1x128xf32>
    %14 = vector.shape_cast %13 : vector<1x1x128xf32> to vector<1x128xf32>
    %15 = vector.broadcast %12 : vector<8x1xf32> to vector<8x128xf32>
    %16 = vector.broadcast %14 : vector<1x128xf32> to vector<8x128xf32>
    %17 = arith.addf %15, %16 : vector<8x128xf32>
    %18 = arith.mulf %10, %17 : vector<8x128xf32>
    %19 = vector.shape_cast %18 : vector<8x128xf32> to vector<1x8x128xf32>
    %cst_15 = arith.constant dense<0.000000e+00> : vector<1xf32>
    %20 = vector.multi_reduction <add>, %19, %cst_15 [1, 2] : vector<1x8x128xf32> to vector<1xf32>
    %21 = vector.shape_cast %20 : vector<1xf32> to vector<1x1x1xf32>
    %22 = vector.extract %21[0, 0, 0] : f32 from vector<1x1x1xf32>
    %23 = vector.broadcast %22 : f32 to vector<1x128xf32>
    %c0_16 = arith.constant 0 : index
    %c0_17 = arith.constant 0 : index
    %24 = vector.load %arg8[%c0_16, %c0_17] : memref<1x128xf32, #tpu.memory_space<vmem>>, vector<1x128xf32>
    tpu.vector_store %arg8[%c0_16, %c0_17], %23 {strides = array<i32>} : memref<1x128xf32, #tpu.memory_space<vmem>>, vector<1x128xf32>,
    return
  }
  func.func @transform_0(%arg0: i32, %arg1: i32) -> (i32, i32, i32) {
    %c0_i32 = arith.constant 0 : i32
    %c0_i32_0 = arith.constant 0 : i32
    return %arg0, %c0_i32, %arg1 : i32, i32, i32
  }
  func.func @transform_1(%arg0: i32, %arg1: i32) -> (i32, i32, i32) {
    %c0_i32 = arith.constant 0 : i32
    %c0_i32_0 = arith.constant 0 : i32
    return %arg0, %c0_i32, %arg1 : i32, i32, i32
  }
  func.func @transform_2(%arg0: i32, %arg1: i32) -> (i32, i32) {
    %c0_i32 = arith.constant 0 : i32
    %c0_i32_0 = arith.constant 0 : i32
    %c0_i32_1 = arith.constant 0 : i32
    return %c0_i32, %c0_i32_0 : i32, i32
  }
  func.func @transform_3(%arg0: i32, %arg1: i32) -> (i32, i32) {
    %c0_i32 = arith.constant 0 : i32
    %c0_i32_0 = arith.constant 0 : i32
    %c0_i32_1 = arith.constant 0 : i32
    return %c0_i32, %c0_i32_0 : i32, i32
  }
  func.func @transform_4(%arg0: i32, %arg1: i32) -> (i32, i32, i32) {
    %c0_i32 = arith.constant 0 : i32
    %c0_i32_0 = arith.constant 0 : i32
    %c0_i32_1 = arith.constant 0 : i32
    return %arg0, %c0_i32, %c0_i32_0 : i32, i32, i32
  }
  func.func @transform_5(%arg0: i32, %arg1: i32) -> (i32, i32, i32) {
    %c0_i32 = arith.constant 0 : i32
    %c0_i32_0 = arith.constant 0 : i32
    return %arg0, %c0_i32, %arg1 : i32, i32, i32
  }
  func.func @transform_6(%arg0: i32, %arg1: i32) -> (i32, i32) {
    %c1_i32 = arith.constant 1 : i32
    %0 = arith.muli %arg0, %c1_i32 : i32
    %1 = arith.addi %0, %arg1 : i32
    %c0_i32 = arith.constant 0 : i32
    %c0_i32_0 = arith.constant 0 : i32
    return %c0_i32, %1 : i32, i32
  }
}

</mosaic_0001>

<bundles_post_ra>
// kernel: tpu_custom_call.1
= control target key start
LH: loop header
LB: loop body
LE: loop exit
PB: predicated region body
PF: predicated region fallthrough
CT: control target
= control target key end

     0   :  { %11 = vsyncpa [#allocation3], 0  ;;  %s994_s0 = inlined_call_operand.hbm [shape: bf16[2,32,128], index: 0, kind: input, shape index: {}]   ;;  %s995_s1 = inlined_call_operand.vmem [shape: f32[2,8,128], index: 1, kind: input, shape index: {}]   ;;  %s996_s2 = inlined_call_operand.vmem [shape: bf16[8,32], index: 2, kind: input, shape index: {}]   ;;  %s997_s3 = inlined_call_operand.vmem [shape: f32[8,1], index: 3, kind: input, shape index: {}]   ;;  %s998_s4 = inlined_call_operand.vmem [shape: f32[2,8,1], index: 4, kind: input, shape index: {}]   ;;  %s999_s5 = inlined_call_operand.vmem [shape: f32[2,1,128], index: 5, kind: input, shape index: {}]   ;;  %s1000_s6 = inlined_call_operand.hbm [shape: f32[1,256], index: 6, kind: output, shape index: {}]  }
   0x1   :  { %13 = vsyncpa [#allocation3 + $0x1], 0 }
   0x2   :  { %14 = vsyncpa [#allocation4], 0 }
   0x3   :  { %16 = vsyncpa [#allocation4 + $0x1], 0  ;;  %s838_s21 = smov 0   ;;  %s840_s22 = smov 0  }
   0x4   :  { %s842_s23 = smov 0   ;;  %s844_s24 = smov 0  }
   0x5   :  { %s846_s25 = smov 0   ;;  %s848_s26 = smov 0  }
   0x6 LB: > { %s584_s27 = sadd.s32 4294967295, %s794_s26   ;;  %s585_s28 = sadd.s32 4294967294, %s794_s26   ;;  %s794_s26 = sphi %s848_s26, %s22_s26   ;;  %s790_s25 = sphi %s846_s25, %s1011_s25   ;;  %s786_s24 = sphi %s844_s24, %s1010_s24   ;;  %s782_s23 = sphi %s842_s23, %s1009_s23   ;;  %s778_s22 = sphi %s840_s22, %s1008_s22   ;;  %s774_s21 = sphi %s838_s21, %s1007_s21  }
   0x7   : > { %s34_s29 = sadd.s32 1, %s790_s25  ;;  %s43_s30 = sadd.s32 1, %s782_s23 }
   0x8   : > { %p36_p0 = scmp.ge.s32.totalorder %s34_s29, 2  ;;  %p50_p1 = scmp.ne.s32.totalorder %s782_s23, %s778_s22 }
   0x9   : > { %p51_p2 = scmp.eq.s32.totalorder %s794_s26, 0  ;;  %p56_p3 = scmp.ne.s32.totalorder %s778_s22, %s774_s21 }
   0xa   : > { %s1013_s29 = smov (%p36_p0, %s34_s29), 0  ;;  %p57_p5 = scmp.eq.s32.totalorder %s584_s27, 0 }
   0xb   : > { %p879_p4 = por %p51_p2, %p50_p1  ;;  %s38_s8 = ssub.s32 %s790_s25, %s1013_s29 }
   0xc   : > { %p206_p6 = scmp.eq.s32.totalorder %s584_s27, 1  ;;  %p41_p7 = scmp.eq.s32.totalorder %s38_s8, 0 }
   0xd   : > { %p885_p8 = por %p57_p5, %p56_p3  ;;  %p212_p10 = scmp.eq.s32.totalorder %s585_s28, 1 }
   0xe   : > { %p889_p9 = por %p206_p6, %p50_p1  ;;  %p628_p13 = scmp.lt.s32.totalorder %s794_s26, 2 }
   0xf   : > { %s894_s11 = scalar_select %p41_p7, %s782_s23, %s43_s30  }
  0x10   : > { %p896_p11 = por %p212_p10, %p56_p3  ;;  %s238_s13 = sand.u32 1, %s782_s23  }
  0x11   : > { %s588_s14 = sshll.u32 %s238_s13, 4  ;;  %s602_s15 = sshll.u32 %s790_s25, 8 }
  0x12   : > { %s249_s18 = scalar_lea.hbm %s994_s0, %s602_s15  ;;  %s242_s19 = scalar_lea.vmem [#allocation2], %s588_s14 }
  0x13   : > { %s250_s20 = sshll.u32 %s242_s19, 4  ;;  %p909_p0 = pnand %p628_p13, %p879_p4  ;;  %s251_s20 = int_to_ptr.vmem [resolvable:$true] %s250_s20 }
  0x14   : > { %p591_p1 = scmp.ge.s32.totalorder %s794_s26, 1  ;;  %s239_s28 = scalar_lea.sflag [#allocation3], %s238_s13 }
  0x15   : > { %p688_p2 = pneg %p909_p0  ;;  %s699_s30 = scalar_lea.vmem %s251_s20, 256 }
  0x16   : > { %p700_p3 = scmp.ne.s32.totalorder %s251_s20, %s699_s30  ;;  %s796_s8 = smov [#allocation2]  }
  0x17   : > { %s704_s16 = sshll.u32 %s796_s8, 4  ;;  %s705_s16 = int_to_ptr.vmem [resolvable:$false] %s704_s16 }
  0x18   : > { %p702_p5 = pnand %p700_p3, %p688_p2  ;;  %s706_s14 = scalar_lea.vmem %s705_s16, 512 }
  0x19   : > { %p707_p7 = scmp.lt.s32.totalorder %s251_s20, %s705_s16  ;;  %p708_p10 = scmp.lt.s32.totalorder %s706_s14, %s699_s30 }
  0x1a   : > { %p703_p6 = pneg %p702_p5 }
  0x1b   : > { %p709_p12 = por %p708_p10, %p707_p7 }
  0x1d   : > { %p710_p4 = pnand %p709_p12, %p703_p6 }
  0x1f   : > { %713 = shalt.err (!%p710_p4)
}
  0x20   : > { %s797_s7 = smov 64   ;;  %s798_s13 = smov 4  }
  0x21   : > { %623 = dma.hbm_to_vmem [thread:$0]  (!%p909_p0), %s249_s18, 256, %s251_s20, %s239_s28, %s797_s7, %s797_s7, %s798_s13  }
  0x22   : > { %p284_p13 = scmp.lt.s32.totalorder %s794_s26, 3 }
  0x24   : > { %p285_p2 = pnand %p591_p1, %p284_p13 }
  0x25   : > { %s922_s15 = sand.u32 (!%p285_p2), 1, %s778_s22  }
  0x26   : > { %288 = sbr.rel (%p285_p2) target bundleno = 468 (0x1d4), region = 44  ;;  %s592_s17 = sshll.u32 (!%p285_p2), %s922_s15, 4 }
  0x27   : > { %s291_s19 = scalar_lea.sflag (!%p285_p2), [#allocation3], %s922_s15  ;;  %s294_s30 = scalar_lea.vmem (!%p285_p2), [#allocation2], %s592_s17 }
  0x2b   : > { %765 = dma.done.wait (%p885_p8), %s291_s19, 256  }
  0x2c   : > { %767 = vsyncadd (%p885_p8), %s291_s19, 4294967040  ;;  %p339_p12 = scmp.lt.s32.totalorder %s786_s24, 1  ;;  %v799_v0 = vmov 0.0   ;;  %vm800_vm0 = vmmov 0   ;;  %v801_v1 = vmov 0   ;;  %v684_v2 = vld [vmem:[%s294_s30 + $0x8] sm:$0xff]  }
  0x2d   : > { %606 = vmatprep.subr.bf16.mxu0 %v799_v0  ;;  %610 = vmatprep.mubr.msk.bf16.mxu0 %vm800_vm0, %v799_v0  ;;  %v685_v3 = vld [vmem:[%s294_s30] sm:$0xff]   ;;  %vm381_vm1 = vcmask 261120   ;;  %s455_s13 = scalar_lea.sflag [#allocation4], %s922_s15 }
  0x2e   : > { %683 = vset.pattern.permute.xlu0 %v801_v1  ;;  %s340_s18 = scalar_select %p339_p12, %s786_s24, 1  ;;  %607 = vmatpush3.bf16.msra.mxu0 %v684_v2  ;;  %v363_v4 = vld [vmem:[%s997_s3] sm:$0xff] }
  0x2f   : > { %608 = vmatprep.subr.bf16.mxu0 %v799_v0  ;;  %366 = vperm.xlu0 %683, %v363_v4   ;;  %v362_v6 = vld [vmem:[%s996_s2] sm:$0xf] }
  0x30   : > { %s593_s20 = sshll.u32 %s340_s18, 3  ;;  %s355_s28 = scalar_lea.vmem %s999_s5, %s340_s18 }
  0x31   : > { %s349_s8 = scalar_lea.vmem %s998_s4, %s593_s20  ;;  %s345_s19 = scalar_lea.vmem %s995_s1, %s593_s20  ;;  %v598_v11 = vld [vmem:[%s355_s28] ss:$0 sm:$0xff] }
  0x32   : > { %v428_v5 = vld [vmem:[%s349_s8] sm:$0xff]  ;;  %609 = vmatpush3.bf16.msra.mxu0 %v685_v3  ;;  %s338_s18 = scalar_lea.vmem [#allocation5], %s922_s15  ;;  %s599_s8 = sshll.u32 %s786_s24, 4 }
  0x33   : > { %432 = vperm.xlu0 %683, %v428_v5   ;;  %v425_v9 = vld [vmem:[%s345_s19] sm:$0xff]  ;;  %s468_s20 = sshll.u32 %s338_s18, 4  ;;  %s466_s7 = scalar_lea.hbm %s1000_s6, %s599_s8  ;;  %s949_s20 = int_to_ptr.vmem [resolvable:$true] %s468_s20 }
  0x34   : > { %s714_s17 = scalar_lea.vmem %s949_s20, 16  ;;  %s802_s19 = smov [#allocation5]  }
  0x35   : > { %611 = vmatmul.mubr.msk.bf16.vlgmr.msra.gmra.mxu0 %vm381_vm1, %v362_v6  ;;  %p715_p8 = scmp.ne.s32.totalorder %s949_s20, %s714_s17  ;;  %s718_s24 = sshll.u32 %s802_s19, 4  ;;  %s719_s24 = int_to_ptr.vmem [resolvable:$false] %s718_s24 }
  0x36   : > { %s720_s30 = scalar_lea.vmem %s719_s24, 32  ;;  %p721_p3 = scmp.lt.s32.totalorder %s949_s20, %s719_s24 }
  0x37   : > { %p716_p0 = pnand %p715_p8, %p889_p9  ;;  %p722_p5 = scmp.lt.s32.totalorder %s720_s30, %s714_s17 }
  0x39   : > { %p717_p1 = pneg %p716_p0  ;;  %p723_p6 = por %p722_p5, %p721_p3 }
  0x3b   : > { %p724_p7 = pnand %p723_p6, %p717_p1 }
  0xaa   : > { %v367_v7 = vpop.permute.xlu0 %366 }
  0xae   : > { %v433_v12 = vpop.permute.xlu0 %432 }
  0xaf   : > { %v441_v16 = vadd.f32 %v598_v11, %v433_v12 }
  0xf5   : > { %v419_v8 = vpop.f32.mrf.mxu0 }
  0xf6   : > { %v420_v10 = vadd.f32 %v419_v8, %v367_v7 }
  0xf7   : > { %v612_v13 = vpop.f32.mrf.mxu0 }
  0xf8   : > { %v426_v14 = vsub.f32 %v425_v9, %v420_v10 }
  0xf9   : > { %v422_v15 = vpop.f32.mrf.mxu0 }
  0xfa   : > { %v427_v17 = vand.u32 2147483647, %v426_v14 }
  0xfb   : > { %v613_v18 = vpop.f32.mrf.mxu0 }
  0xfc   : > { %v442_v19 = vmul.f32 %v441_v16, %v427_v17 }
  0xfe   : > { %443 = vadd.xlane.f32.xlu1 %v442_v19 }
 0x187   : > { %v444_v20 = vpop.xlane.xlu1 %443 }
 0x188   : > { %v445_v21 = vrot.slane %v444_v20, 4 }
 0x18a   : > { %v446_v22 = vadd.f32 %v445_v21, %v444_v20 }
 0x18c   : > { %v447_v23 = vrot.slane %v446_v22, 2 }
 0x18e   : > { %v448_v24 = vadd.f32 %v447_v23, %v446_v22 }
 0x190   : > { %v449_v25 = vrot.slane %v448_v24, 1 }
 0x192   : > { %v450_v26 = vadd.f32 %v449_v25, %v448_v24 }
 0x194   : > { %614 = vpush %v450_v26 }
 0x1c5   : > { %s615_s9 = spop %614 }
 0x1c6   : > { %v452_v27 = vstv %s615_s9 }
 0x1c7   : > { %453 = vst [vmem:[%s338_s18] sm:$0x1] %v452_v27 }
 0x1c8   : > { %727 = shalt.err (!%p724_p7)
}
 0x1c9   : > { %s728_s27 = scalar_lea.hbm %s466_s7, 16  ;;  %s732_s18 = scalar_lea.hbm %s1000_s6, 32 }
 0x1ca   : > { %p729_p10 = scmp.ne.s32.totalorder %s466_s7, %s728_s27  ;;  %p733_p2 = scmp.lt.s32.totalorder %s466_s7, %s1000_s6 }
 0x1cb   : > { %p734_p12 = scmp.lt.s32.totalorder %s732_s18, %s728_s27 }
 0x1cc   : > { %p730_p4 = pnand %p729_p10, %p889_p9 }
 0x1cd   : > { %p735_p8 = por %p734_p12, %p733_p2 }
 0x1ce   : > { %p731_p13 = pneg %p730_p4 }
 0x1d0   : > { %p736_p0 = pnand %p735_p8, %p731_p13 }
 0x1d2   : > { %739 = shalt.err (!%p736_p0)
}
 0x1d3   : > { %618 = dma.vmem_to_hbm [thread:$0]  (%p889_p9), %s949_s20, 16, %s466_s7, %s455_s13  }
 0x1d4 PF: > { %s480_s16 = sand.u32 1, %s774_s21   ;;  %p1006_p1 = scmp.ge.s32.totalorder %s794_s26, 2 }
 0x1d5   : > { %s481_s14 = scalar_lea.sflag [#allocation4], %s480_s16 }
 0x1d6   : > { %p625_p3 = pnand %p1006_p1, %p896_p11 }
 0x1d8   : > { %p626_p5 = pneg %p625_p3 }
 0x1da   : > { %769 = dma.done.wait (%p626_p5), %s481_s14, 16  }
 0x1db   : > { %771 = vsyncadd (%p626_p5), %s481_s14, 4294967280  ;;  %s22_s26 = sadd.s32 1, %s794_s26   ;;  %s1007_s21 = smov %s778_s22 }
 0x1dc   : > { %p19_p6 = scmp.ge.s32.totalorder %s22_s26, 4   ;;  %s1008_s22 = smov %s782_s23 }
 0x1dd   : > { %s1009_s23 = smov %s894_s11  ;;  %s1010_s24 = smov %s790_s25 }
 0x1de   : > { %s1011_s25 = smov %s1013_s29  ;;  %21 = sbr.rel (!%p19_p6) target bundleno = 6 (0x6), region = 98 }
 0x1e3   :  { %485 = vsyncpa [#allocation3], 1 }
 0x1e4   :  { %487 = vsyncpa [#allocation3 + $0x1], 1 }
 0x1e5   :  { %488 = vsyncpa [#allocation4], 1 }
 0x1e6   :  { %490 = vsyncpa [#allocation4 + $0x1], 1 }

</bundles_post_ra>
